<compile_context>
chip_gen: v7x
topology: tpu7x:2x2x1
jax: 0.10.0
libtpu: 0.0.40
codegen_flags: <defaults>
</compile_context>

<pallas_src>
import functools

import numpy as np
import jax
import jax.numpy as jnp
from jax.experimental import pallas as pl
from jax.experimental.pallas import tpu as pltpu


# ---------------------------------------------------------------------------
# Pallas kernel: fused 3x3 conv (+ folded BN bias) + tanh/2 + 0.5 on one tile
# ---------------------------------------------------------------------------

def _conv_bn_tanh_kernel(xt_ref, w_ref, b_ref, o_ref):
  """One row-tile of the fused ConvBnTanh2d.

  xt_ref: (1, TH+2, W+2, Cin)  bf16  zero-padded input tile (with 1-row halo)
  w_ref:  (9*Cin, Cout)        bf16  BN-folded weights, tap-major
  b_ref:  (1, Cout)            f32   BN-folded bias
  o_ref:  (1, TH, W, Cout)     f32   output tile
  """
  _, th, w, cout = o_ref.shape

  # Form the 9 conv taps as shifted slices of the padded tile (no HBM im2col),
  # concatenated along channels -> a single deep-contraction MXU matmul.
  taps = [xt_ref[0, dy:dy + th, dx:dx + w, :]          # (TH, W, Cin) bf16
          for dy in range(3) for dx in range(3)]
  patches = jnp.concatenate(taps, axis=-1)             # (TH, W, 9*Cin)
  patches = patches.reshape(th * w, patches.shape[-1])  # (TH*W, 9*Cin)

  acc = jnp.dot(patches, w_ref[...],
                preferred_element_type=jnp.float32)     # (TH*W, Cout) f32
  acc = acc + b_ref[...]                                # folded conv+BN bias
  y = jnp.tanh(acc) * 0.5 + 0.5                         # ConvBnTanh2d epilogue

  o_ref[...] = y.reshape(1, th, w, cout).astype(o_ref.dtype)


# ---------------------------------------------------------------------------
# Wrapper
# ---------------------------------------------------------------------------

def _pick_tile_h(H, W, Cin, Cout, budget_bytes=6 * 1024 * 1024):
  """Largest divisor of H whose double-buffered working set fits the budget."""
  best = 1
  for th in range(1, H + 1):
    if H % th:
      continue
    in_b = (th + 2) * (W + 2) * Cin * 2          # bf16 input tile
    out_b = th * W * Cout * 4                    # f32 output tile
    tmp_b = th * W * 9 * Cin * 2 + th * W * Cout * 4
    total = 2 * (in_b + out_b) + tmp_b + 9 * Cin * Cout * 2
    if total <= budget_bytes:
      best = th
  return best


def conv_bn_tanh_2d(x_nchw, params, *, tile_h=None):
  """Fused Conv2d(3x3, pad=1) + BatchNorm2d(eval) + tanh/2 + 0.5.

  x_nchw: (N, Cin, H, W) f32 (PyTorch layout).  Returns (N, Cout, H, W) f32.
  """
  w = params["w"]                                   # (3, 3, Cin, Cout)
  b = params["b"]                                   # (Cout,)
  eps = 1e-5
  scale = params["bn_gamma"] * jax.lax.rsqrt(params["bn_var"] + eps)
  w_fold = w * scale                                # broadcast over Cout
  b_fold = (b - params["bn_mean"]) * scale + params["bn_beta"]

  N, Cin, H, W = x_nchw.shape
  Cout = w.shape[-1]

  # NCHW -> NHWC, zero-pad spatially, cast matmul operand to bf16.
  x = jnp.transpose(x_nchw, (0, 2, 3, 1))
  xp = jnp.pad(x, ((0, 0), (1, 1), (1, 1), (0, 0))).astype(jnp.bfloat16)

  th = tile_h if tile_h is not None else _pick_tile_h(H, W, Cin, Cout)
  assert H % th == 0, f"tile_h={th} must divide H={H}"
  n_t = H // th

  # Halo'd row tiles: (N * n_t, TH+2, W+2, Cin).
  xt = jnp.stack([xp[:, i * th:i * th + th + 2] for i in range(n_t)], axis=1)
  xt = xt.reshape(N * n_t, th + 2, W + 2, Cin)

  w2 = w_fold.reshape(9 * Cin, Cout).astype(jnp.bfloat16)
  b2 = b_fold.reshape(1, Cout).astype(jnp.float32)

  grid = (N * n_t,)
  out = pl.pallas_call(
      _conv_bn_tanh_kernel,
      out_shape=jax.ShapeDtypeStruct((N * n_t, th, W, Cout), jnp.float32),
      grid=grid,
      in_specs=[
          pl.BlockSpec((1, th + 2, W + 2, Cin), lambda g: (g, 0, 0, 0)),
          pl.BlockSpec((9 * Cin, Cout), lambda g: (0, 0)),   # resident weights
          pl.BlockSpec((1, Cout), lambda g: (0, 0)),         # resident bias
      ],
      out_specs=pl.BlockSpec((1, th, W, Cout), lambda g: (g, 0, 0, 0)),
      compiler_params=pltpu.CompilerParams(
          dimension_semantics=("parallel",),
          vmem_limit_bytes=32 * 1024 * 1024),
  )(xt, w2, b2)

  out = out.reshape(N, H, W, Cout)
  return jnp.transpose(out, (0, 3, 1, 2))           # back to NCHW


# ---------------------------------------------------------------------------
# Pure-JAX reference (for correctness check only)
# ---------------------------------------------------------------------------

def _reference(x_nchw, p):
  w_oihw = jnp.transpose(p["w"], (3, 2, 0, 1))      # (Cout, Cin, 3, 3)
  y = jax.lax.conv_general_dilated(
      x_nchw, w_oihw, window_strides=(1, 1), padding=((1, 1), (1, 1)),
      dimension_numbers=("NCHW", "OIHW", "NCHW"))
  y = y + p["b"][None, :, None, None]
  scale = p["bn_gamma"] / jnp.sqrt(p["bn_var"] + 1e-5)
  y = ((y - p["bn_mean"][None, :, None, None]) * scale[None, :, None, None]
       + p["bn_beta"][None, :, None, None])
  return jnp.tanh(y) * 0.5 + 0.5


# ---------------------------------------------------------------------------

if __name__ == "__main__":
  key = jax.random.PRNGKey(0)
  k_x, k_w, k_b, k_g, k_be = jax.random.split(key, 5)

  N, Cin, H, W, Cout = 2, 4, 16, 16, 8
  x = jax.random.normal(k_x, (N, Cin, H, W), jnp.float32)

  bound = 1.0 / np.sqrt(Cin * 9)
  params = {
      "w": jax.random.uniform(k_w, (3, 3, Cin, Cout), jnp.float32,
                              -bound, bound),
      "b": jax.random.uniform(k_b, (Cout,), jnp.float32, -bound, bound),
      "bn_gamma": jax.random.uniform(k_g, (Cout,), jnp.float32, 0.5, 1.5),
      "bn_beta": jax.random.uniform(k_be, (Cout,), jnp.float32, -0.5, 0.5),
      "bn_mean": jnp.full((Cout,), 0.1, jnp.float32),
      "bn_var": jnp.full((Cout,), 0.9, jnp.float32),
  }

  fwd = jax.jit(functools.partial(conv_bn_tanh_2d, tile_h=8))
  out = jax.block_until_ready(fwd(x, params))

  assert out.shape == (N, Cout, H, W), out.shape
  assert bool(jnp.all(jnp.isfinite(out)))
  assert float(out.min()) >= 0.0 and float(out.max()) <= 1.0

  ref = _reference(x, params)
  max_err = float(jnp.max(jnp.abs(out - ref)))
  assert max_err < 2.5e-2, f"max abs error vs reference: {max_err}"

  print("KERNEL_OK")
</pallas_src>

<mosaic_0001>
module attributes {stable_mosaic.version = 11 : i64} {
  func.func @_conv_bn_tanh_kernel(%arg0: i32, %arg1: memref<1x10x18x4xbf16, #tpu.memory_space<vmem>>, %arg2: memref<36x8xbf16, #tpu.memory_space<vmem>>, %arg3: memref<1x8xf32, #tpu.memory_space<vmem>>, %arg4: memref<1x8x16x8xf32, #tpu.memory_space<vmem>>) attributes {dimension_semantics = [#tpu.dimension_semantics<parallel>], iteration_bounds = array<i64: 4>, scalar_prefetch = 0 : i64, scratch_operands = 0 : i64, tpu.core_type = #tpu.core_type<tc>, window_params = [{transform_indices = @transform_0, window_bounds = array<i64: 1, 10, 18, 4>}, {pipeline_mode = #tpu.pipeline_mode<synchronous>, transform_indices = @transform_1, window_bounds = array<i64: 36, 8>}, {pipeline_mode = #tpu.pipeline_mode<synchronous>, transform_indices = @transform_2, window_bounds = array<i64: 1, 8>}, {transform_indices = @transform_3, window_bounds = array<i64: 1, 8, 16, 8>}]} {
    %c0 = arith.constant 0 : index
    %c0_0 = arith.constant 0 : index
    %c0_1 = arith.constant 0 : index
    %c0_2 = arith.constant 0 : index
    %0 = vector.load %arg1[%c0, %c0_0, %c0_1, %c0_2] : memref<1x10x18x4xbf16, #tpu.memory_space<vmem>>, vector<1x8x16x4xbf16>
    %1 = vector.shape_cast %0 : vector<1x8x16x4xbf16> to vector<8x16x4xbf16>
    %c0_3 = arith.constant 0 : index
    %c0_4 = arith.constant 0 : index
    %c1 = arith.constant 1 : index
    %c0_5 = arith.constant 0 : index
    %2 = vector.load %arg1[%c0_3, %c0_4, %c1, %c0_5] : memref<1x10x18x4xbf16, #tpu.memory_space<vmem>>, vector<1x8x16x4xbf16>
    %3 = vector.shape_cast %2 : vector<1x8x16x4xbf16> to vector<8x16x4xbf16>
    %c0_6 = arith.constant 0 : index
    %c0_7 = arith.constant 0 : index
    %c2 = arith.constant 2 : index
    %c0_8 = arith.constant 0 : index
    %4 = vector.load %arg1[%c0_6, %c0_7, %c2, %c0_8] : memref<1x10x18x4xbf16, #tpu.memory_space<vmem>>, vector<1x8x16x4xbf16>
    %5 = vector.shape_cast %4 : vector<1x8x16x4xbf16> to vector<8x16x4xbf16>
    %c0_9 = arith.constant 0 : index
    %c1_10 = arith.constant 1 : index
    %c0_11 = arith.constant 0 : index
    %c0_12 = arith.constant 0 : index
    %6 = vector.load %arg1[%c0_9, %c1_10, %c0_11, %c0_12] : memref<1x10x18x4xbf16, #tpu.memory_space<vmem>>, vector<1x8x16x4xbf16>
    %7 = vector.shape_cast %6 : vector<1x8x16x4xbf16> to vector<8x16x4xbf16>
    %c0_13 = arith.constant 0 : index
    %c1_14 = arith.constant 1 : index
    %c1_15 = arith.constant 1 : index
    %c0_16 = arith.constant 0 : index
    %8 = vector.load %arg1[%c0_13, %c1_14, %c1_15, %c0_16] : memref<1x10x18x4xbf16, #tpu.memory_space<vmem>>, vector<1x8x16x4xbf16>
    %9 = vector.shape_cast %8 : vector<1x8x16x4xbf16> to vector<8x16x4xbf16>
    %c0_17 = arith.constant 0 : index
    %c1_18 = arith.constant 1 : index
    %c2_19 = arith.constant 2 : index
    %c0_20 = arith.constant 0 : index
    %10 = vector.load %arg1[%c0_17, %c1_18, %c2_19, %c0_20] : memref<1x10x18x4xbf16, #tpu.memory_space<vmem>>, vector<1x8x16x4xbf16>
    %11 = vector.shape_cast %10 : vector<1x8x16x4xbf16> to vector<8x16x4xbf16>
    %c0_21 = arith.constant 0 : index
    %c2_22 = arith.constant 2 : index
    %c0_23 = arith.constant 0 : index
    %c0_24 = arith.constant 0 : index
    %12 = vector.load %arg1[%c0_21, %c2_22, %c0_23, %c0_24] : memref<1x10x18x4xbf16, #tpu.memory_space<vmem>>, vector<1x8x16x4xbf16>
    %13 = vector.shape_cast %12 : vector<1x8x16x4xbf16> to vector<8x16x4xbf16>
    %c0_25 = arith.constant 0 : index
    %c2_26 = arith.constant 2 : index
    %c1_27 = arith.constant 1 : index
    %c0_28 = arith.constant 0 : index
    %14 = vector.load %arg1[%c0_25, %c2_26, %c1_27, %c0_28] : memref<1x10x18x4xbf16, #tpu.memory_space<vmem>>, vector<1x8x16x4xbf16>
    %15 = vector.shape_cast %14 : vector<1x8x16x4xbf16> to vector<8x16x4xbf16>
    %c0_29 = arith.constant 0 : index
    %c2_30 = arith.constant 2 : index
    %c2_31 = arith.constant 2 : index
    %c0_32 = arith.constant 0 : index
    %16 = vector.load %arg1[%c0_29, %c2_30, %c2_31, %c0_32] : memref<1x10x18x4xbf16, #tpu.memory_space<vmem>>, vector<1x8x16x4xbf16>
    %17 = vector.shape_cast %16 : vector<1x8x16x4xbf16> to vector<8x16x4xbf16>
    %18 = tpu.concatenate %1, %3, %5, %7, %9, %11, %13, %15, %17 in 2 : vector<8x16x4xbf16>, vector<8x16x4xbf16>, vector<8x16x4xbf16>, vector<8x16x4xbf16>, vector<8x16x4xbf16>, vector<8x16x4xbf16>, vector<8x16x4xbf16>, vector<8x16x4xbf16>, vector<8x16x4xbf16> -> vector<8x16x36xbf16>
    %19 = vector.shape_cast %18 : vector<8x16x36xbf16> to vector<128x36xbf16>
    %c0_33 = arith.constant 0 : index
    %c0_34 = arith.constant 0 : index
    %20 = vector.load %arg2[%c0_33, %c0_34] : memref<36x8xbf16, #tpu.memory_space<vmem>>, vector<36x8xbf16>
    %cst = arith.constant dense<0.000000e+00> : vector<128x8xf32>
    %21 = tpu.matmul %19, %20, %cst {dimension_numbers = #tpu.dot_dimension_numbers<[1], [0], [0], [1], [0, 0, 1, 1], [], []>} : vector<128x36xbf16>, vector<36x8xbf16>, vector<128x8xf32> -> vector<128x8xf32>
    %c0_35 = arith.constant 0 : index
    %c0_36 = arith.constant 0 : index
    %22 = vector.load %arg3[%c0_35, %c0_36] : memref<1x8xf32, #tpu.memory_space<vmem>>, vector<1x8xf32>
    %23 = vector.broadcast %22 : vector<1x8xf32> to vector<128x8xf32>
    %24 = arith.addf %21, %23 : vector<128x8xf32>
    %25 = math.tanh %24 : vector<128x8xf32>
    %cst_37 = arith.constant 5.000000e-01 : f32
    %26 = vector.broadcast %cst_37 : f32 to vector<128x8xf32>
    %27 = arith.mulf %25, %26 : vector<128x8xf32>
    %cst_38 = arith.constant 5.000000e-01 : f32
    %28 = vector.broadcast %cst_38 : f32 to vector<128x8xf32>
    %29 = arith.addf %27, %28 : vector<128x8xf32>
    %30 = vector.shape_cast %29 : vector<128x8xf32> to vector<1x8x16x8xf32>
    %c0_39 = arith.constant 0 : index
    %c0_40 = arith.constant 0 : index
    %c0_41 = arith.constant 0 : index
    %c0_42 = arith.constant 0 : index
    %31 = vector.load %arg4[%c0_39, %c0_40, %c0_41, %c0_42] : memref<1x8x16x8xf32, #tpu.memory_space<vmem>>, vector<1x8x16x8xf32>
    tpu.vector_store %arg4[%c0_39, %c0_40, %c0_41, %c0_42], %30 {strides = array<i32>} : memref<1x8x16x8xf32, #tpu.memory_space<vmem>>, vector<1x8x16x8xf32>,
    return
  }
  func.func @transform_0(%arg0: i32) -> (i32, i32, i32, i32) {
    %c0_i32 = arith.constant 0 : i32
    %c0_i32_0 = arith.constant 0 : i32
    %c0_i32_1 = arith.constant 0 : i32
    %c0_i32_2 = arith.constant 0 : i32
    return %arg0, %c0_i32, %c0_i32_0, %c0_i32_1 : i32, i32, i32, i32
  }
  func.func @transform_1(%arg0: i32) -> (i32, i32) {
    %c0_i32 = arith.constant 0 : i32
    %c0_i32_0 = arith.constant 0 : i32
    %c0_i32_1 = arith.constant 0 : i32
    return %c0_i32, %c0_i32_0 : i32, i32
  }
  func.func @transform_2(%arg0: i32) -> (i32, i32) {
    %c0_i32 = arith.constant 0 : i32
    %c0_i32_0 = arith.constant 0 : i32
    %c0_i32_1 = arith.constant 0 : i32
    return %c0_i32, %c0_i32_0 : i32, i32
  }
  func.func @transform_3(%arg0: i32) -> (i32, i32, i32, i32) {
    %c0_i32 = arith.constant 0 : i32
    %c0_i32_0 = arith.constant 0 : i32
    %c0_i32_1 = arith.constant 0 : i32
    %c0_i32_2 = arith.constant 0 : i32
    return %arg0, %c0_i32, %c0_i32_0, %c0_i32_1 : i32, i32, i32, i32
  }
}

</mosaic_0001>

<bundles_post_ra>
// kernel: conv_bn_tanh_2d.1
= control target key start
LH: loop header
LB: loop body
LE: loop exit
PB: predicated region body
PF: predicated region fallthrough
CT: control target
= control target key end

     0   :  { %s1784_s12 = smov 0   ;;  %s2356_s0 = inlined_call_operand.vmem [shape: bf16[4,10,18,4], index: 0, kind: input, shape index: {}]   ;;  %s2357_s1 = inlined_call_operand.vmem [shape: bf16[36,8], index: 1, kind: input, shape index: {}]   ;;  %s2358_s2 = inlined_call_operand.vmem [shape: f32[1,8], index: 2, kind: input, shape index: {}]   ;;  %s2359_s3 = inlined_call_operand.vmem [shape: f32[4,8,16,8], index: 3, kind: output, shape index: {}]  }
   0x1 LB: > { %s1424_s13 = sadd.s32 4294967295, %s1754_s12   ;;  %p1428_p0 = scmp.ge.s32.totalorder %s1754_s12, 1  ;;  %s1754_s12 = sphi %s1784_s12, %s13_s12  }
   0x2   : > { %p137_p1 = scmp.lt.s32.totalorder %s1754_s12, 5 }
   0x4   : > { %p138_p2 = pnand %p1428_p0, %p137_p1 }
   0x5   : > { %p161_p3 = scmp.lt.s32.totalorder (!%p138_p2), %s1424_s13, 3  ;;  %s1756_s18 = smov (!%p138_p2), 12   ;;  %vm471_vm0 = vcmask (!%p138_p2), 1046528   ;;  %vm334_vm1 = vsmask.f32 (!%p138_p2), 7424  ;;  %vm1204_vm2 = vcmask (!%p138_p2), 1041408  }
   0x6   : > { %141 = sbr.rel (%p138_p2) target bundleno = 499 (0x1f3), region = 32  ;;  %s1757_s19 = smov (!%p138_p2), 8   ;;  %vm1024_vm3 = vcmask (!%p138_p2), 31744   ;;  %vm1041_vm4 = vcmask (!%p138_p2), 64512   ;;  %vm1058_vm5 = vcmask (!%p138_p2), 97280   ;;  %vm1075_vm6 = vcmask (!%p138_p2), 130048  }
   0x7   : > { %s1758_s20 = smov (!%p138_p2), 4   ;;  %s1759_s21 = smov (!%p138_p2), 16   ;;  %vm1092_vm7 = vcmask (!%p138_p2), 162816   ;;  %vm1109_vm8 = vcmask (!%p138_p2), 195584   ;;  %vm1126_vm9 = vcmask (!%p138_p2), 228352   ;;  %vm1143_vm10 = vcmask (!%p138_p2), 261120  }
   0x8   : > { %s1760_s22 = smov (!%p138_p2), 20   ;;  %s1761_s25 = smov (!%p138_p2), 24   ;;  %vm1187_vm11 = vcmask (!%p138_p2), 293888  }
   0x9   : > { %s1762_s28 = smov (!%p138_p2), 28   ;;  %s1763_s29 = smov (!%p138_p2), 32  }
   0xd   : > { %s2361_s13 = smov (!%p161_p3, %s1424_s13), 3 }
   0xe   : > { %s1624_s14 = smul.u32 120, %s2361_s13  ;;  %s1582_s7 = sshll.u32 %s2361_s13, 7 }
   0xf   : > { %s2311_s10 = scalar_lea.vmem %s2359_s3, %s1582_s7 }
  0x10   : > { %s1798_s17 = scalar_lea.vmem %s2356_s0, %s1624_s14 }
  0x11   : > { %v1440_v0 = vld [vmem:[%s1798_s17 + $0x3c] sm:$0xf]  ;;  %v1802_v1 = vld [vmem:[%s1798_s17 + $0x40] sm:$0xf]  ;;  %v1432_v3 = vld [vmem:[%s1798_s17 + $0xc] sm:$0xf] }
  0x12   : > { %v1805_v2 = vcombine.low %v1440_v0, %v1802_v1  ;;  %v1809_v4 = vld [vmem:[%s1798_s17 + $0x10] sm:$0xf]  ;;  %v181_v6 = vld [vmem:[%s1798_s17 + $0x34] sm:$0xf]  ;;  %v173_v12 = vld [vmem:[%s1798_s17 + $0x4] sm:$0xf] }
  0x13   : > { %v1812_v5 = vcombine.low %v1432_v3, %v1809_v4  ;;  %v200_v7 = vld [vmem:[%s1798_s17 + $0x30] sm:$0xe]  ;;  %v1819_v8 = vld [vmem:[%s1798_s17 + $0x38] ss:$0 sps:$4 sm:$0x11]  }
  0x14   : > { %560 = vrot.lane.b32.xlu1 %v1805_v2, %s1756_s18  ;;  %v1516_v9 = vcombine.low %v200_v7, %v181_v6  ;;  %v180_v10 = vld [vmem:[%s1798_s17 + $0x30] sm:$0xf]  ;;  %v643_v11 = vshll.u32 %v1805_v2, 16  ;;  %v485_v14 = vrot.slane %v1819_v8, 1  ;;  %v196_v15 = vld [vmem:[%s1798_s17] sm:$0xe] }
  0x15   : > { %552 = vrot.lane.b32.xlu0 %v1812_v5, %s1756_s18  ;;  %v172_v16 = vld [vmem:[%s1798_s17] sm:$0xf]  ;;  %v595_v17 = vshll.u32 %v1812_v5, 16  ;;  %v1830_v18 = vcombine.low %v180_v10, %v181_v6  ;;  %v1648_v19 = vld [vmem:[%s1798_s17 + $0x8] ss:$0 sps:$4 sm:$0x11]   ;;  %v1512_v20 = vcombine.low %v196_v15, %v173_v12 }
  0x16   : > { %v484_v13 = vrot.slane %v1516_v9, 1  ;;  %v182_v21 = vld [vmem:[%s1798_s17 + $0x3c] sm:$0xf]  ;;  %v1835_v23 = vcombine.low %v172_v16, %v173_v12  ;;  %v183_v24 = vld [vmem:[%s1798_s17 + $0x40] sm:$0xf]  ;;  %v473_v27 = vrot.slane %v1648_v19, 1 }
  0x17   : > { %v201_v25 = vld [vmem:[%s1798_s17 + $0x3c] sm:$0xe]  ;;  %v472_v26 = vrot.slane %v1512_v20, 1  ;;  %v1652_v28 = vld [vmem:[%s1798_s17 + $0x44] ss:$0 sps:$4 sm:$0x11]   ;;  %v1842_v31 = vcombine.low %v182_v21, %v183_v24 }
  0x18   : > { %v486_v22 = vsel %vm471_vm0, %v484_v13, %v485_v14  ;;  %v1517_v29 = vcombine.low %v201_v25, %v183_v24  ;;  %v384_v30 = vshrl.u32 %v1830_v18, 16  ;;  %v174_v32 = vld [vmem:[%s1798_s17 + $0xc] sm:$0xf]  ;;  %v175_v33 = vld [vmem:[%s1798_s17 + $0x10] sm:$0xf]  ;;  %v488_v36 = vrot.slane %v1652_v28, 1 }
  0x19   : > { %504 = vrot.lane.b32.xlu1 %v486_v22, %s1757_s19  ;;  %v474_v34 = vsel %vm471_vm0, %v472_v26, %v473_v27  ;;  %v197_v37 = vld [vmem:[%s1798_s17 + $0xc] sm:$0xe]  ;;  %v1848_v38 = vcombine.low %v174_v32, %v175_v33  ;;  %v1655_v39 = vld [vmem:[%s1798_s17 + $0x14] ss:$0 sps:$4 sm:$0x11]   ;;  %v336_v41 = vshrl.u32 %v1835_v23, 16 }
  0x1a   : > { %v487_v35 = vrot.slane %v1517_v29, 1  ;;  %496 = vrot.lane.b32.xlu0 %v474_v34, %s1757_s19  ;;  %v1513_v40 = vcombine.low %v197_v37, %v175_v33  ;;  %v338_v42 = vshll.u32 %v1835_v23, 16  ;;  %v343_v43 = vshll.u32 %v1648_v19, 16  ;;  %v1442_v52 = vld [vmem:[%s1798_s17 + $0x48] sm:$0xf] }
  0x1b   : > { %v348_v45 = vshrl.u32 %v1848_v38, 16  ;;  %v350_v46 = vshll.u32 %v1848_v38, 16  ;;  %v396_v47 = vshrl.u32 %v1842_v31, 16  ;;  %v476_v49 = vrot.slane %v1655_v39, 1  ;;  %v1862_v57 = vld [vmem:[%s1798_s17 + $0x4c] sm:$0xf] }
  0x1c   : > { %v489_v44 = vsel %vm471_vm0, %v487_v35, %v488_v36  ;;  %v475_v48 = vrot.slane %v1513_v40, 1  ;;  %v355_v50 = vshll.u32 %v1655_v39, 16  ;;  %v340_v51 = vrot.slane %v338_v42, 1  ;;  %v1434_v62 = vld [vmem:[%s1798_s17 + $0x18] sm:$0xf] }
  0x1d   : > { %506 = vrot.lane.b32.xlu1 %v489_v44, %s1757_s19  ;;  %v352_v53 = vrot.slane %v350_v46, 1  ;;  %v345_v54 = vrot.slane %v343_v43, 1  ;;  %v398_v55 = vshll.u32 %v1842_v31, 16  ;;  %v403_v56 = vshll.u32 %v1652_v28, 16  ;;  %v1868_v63 = vld [vmem:[%s1798_s17 + $0x1c] sm:$0xf] }
  0x1e   : > { %v477_v58 = vsel %vm471_vm0, %v475_v48, %v476_v49  ;;  %v357_v59 = vrot.slane %v355_v50, 1  ;;  %v341_v60 = vor.u32 %v340_v51, %v336_v41  ;;  %v386_v61 = vshll.u32 %v1830_v18, 16  ;;  %v1875_v13 = vld [vmem:[%s1798_s17 + $0x44] ss:$0 sps:$4 sm:$0x11]  }
  0x1f   : > { %498 = vrot.lane.b32.xlu0 %v477_v58, %s1757_s19  ;;  %v353_v0 = vor.u32 %v352_v53, %v348_v45  ;;  %v400_v3 = vrot.slane %v398_v55, 1  ;;  %v405_v6 = vrot.slane %v403_v56, 1  ;;  %v391_v7 = vshll.u32 %v1819_v8, 16  ;;  %v1880_v20 = vld [vmem:[%s1798_s17 + $0x14] ss:$0 sps:$4 sm:$0x11]  }
  0x20   : > { %v346_v9 = vsel %vm334_vm1, %v341_v60, %v345_v54  ;;  %v388_v10 = vrot.slane %v386_v61, 1  ;;  %v1525_v12 = vcombine.low %v1442_v52, %v1862_v57  ;;  %v1521_v19 = vcombine.low %v1434_v62, %v1868_v63  ;;  %v1887_v24 = vld [vmem:[%s1798_s17 + $0x50] ss:$0 sps:$4 sm:$0x11]   ;;  %v1460_v40 = vld [vmem:[%s1798_s17 + $0x3c] sm:$0xe] }
  0x21   : > { %v358_v14 = vsel %vm334_vm1, %v353_v0, %v357_v59  ;;  %v401_v15 = vor.u32 %v400_v3, %v396_v47  ;;  %v393_v16 = vrot.slane %v391_v7, 1  ;;  %v641_v21 = vshrl.u32 %v1805_v2, 16  ;;  %v1456_v43 = vld [vmem:[%s1798_s17 + $0xc] sm:$0xe]  ;;  %v1461_v49 = vld [vmem:[%s1798_s17 + $0x48] sm:$0xe] }
  0x22   : > { %433 = vrot.lane.b32.xlu1 %v358_v14, %s1758_s20  ;;  %v389_v8 = vor.u32 %v388_v10, %v384_v30  ;;  %v645_v22 = vrot.slane %v643_v11, 1  ;;  %v655_v26 = vshll.u32 %v1525_v12, 16  ;;  %v648_v27 = vshll.u32 %v1875_v13, 16  ;;  %v1898_v11 = vld [vmem:[%s1798_s17 + $0x20] ss:$0 sps:$4 sm:$0x11]  }
  0x23   : > { %431 = vrot.lane.b32.xlu0 %v346_v9, %s1758_s20  ;;  %v406_v25 = vsel %vm334_vm1, %v401_v15, %v405_v6  ;;  %v593_v28 = vshrl.u32 %v1812_v5, 16  ;;  %v607_v30 = vshll.u32 %v1521_v19, 16  ;;  %v597_v32 = vrot.slane %v595_v17, 1  ;;  %v1457_v53 = vld [vmem:[%s1798_s17 + $0x18] sm:$0xe] }
  0x24   : > { %v394_v29 = vsel %vm334_vm1, %v389_v8, %v393_v16  ;;  %v600_v2 = vshll.u32 %v1880_v20, 16  ;;  %v646_v33 = vor.u32 %v645_v22, %v641_v21  ;;  %v650_v34 = vrot.slane %v648_v27, 1  ;;  %v1472_v54 = vld [vmem:[%s1798_s17 + $0x48] sm:$0xf]  ;;  %v1464_v55 = vld [vmem:[%s1798_s17 + $0x18] sm:$0xf] }
  0x25   : > { %v598_v35 = vor.u32 %v597_v32, %v593_v28  ;;  %v653_v36 = vshrl.u32 %v1525_v12, 16  ;;  %v657_v37 = vrot.slane %v655_v26, 1  ;;  %v660_v39 = vshll.u32 %v1887_v24, 16  ;;  %v1925_v60 = vld [vmem:[%s1798_s17 + $0x1c] sm:$0xf] }
  0x26   : > { %441 = vrot.lane.b32.xlu1 %v406_v25, %s1758_s20  ;;  %v602_v5 = vrot.slane %v600_v2, 1  ;;  %v605_v17 = vshrl.u32 %v1521_v19, 16  ;;  %v609_v41 = vrot.slane %v607_v30, 1  ;;  %v612_v42 = vshll.u32 %v1898_v11, 16  ;;  %v1474_v7 = vld [vmem:[%s1798_s17 + $0x54] sm:$0xf] }
  0x27   : > { %439 = vrot.lane.b32.xlu0 %v394_v29, %s1758_s20  ;;  %v1540_v44 = vcombine.low %v1460_v40, %v1802_v1  ;;  %v651_v45 = vsel %vm334_vm1, %v646_v33, %v650_v34  ;;  %v658_v46 = vor.u32 %v657_v37, %v653_v36  ;;  %v662_v47 = vrot.slane %v660_v39, 1  ;;  %v1917_v1 = vld [vmem:[%s1798_s17 + $0x4c] sm:$0xf]  ;;  %v1935_v9 = vld [vmem:[%s1798_s17 + $0x58] sm:$0xf] }
  0x28   : > { %v1536_v48 = vcombine.low %v1456_v43, %v1809_v4  ;;  %v603_v50 = vsel %vm334_vm1, %v598_v35, %v602_v5  ;;  %v610_v51 = vor.u32 %v609_v41, %v605_v17  ;;  %v614_v52 = vrot.slane %v612_v42, 1  ;;  %v1942_v14 = vld [vmem:[%s1798_s17 + $0x28] sm:$0xf]  ;;  %v1948_v21 = vld [vmem:[%s1798_s17 + $0x50] ss:$0 sps:$4 sm:$0x11]  }
  0x29   : > { %v1541_v56 = vcombine.low %v1461_v49, %v1862_v57  ;;  %v663_v4 = vsel %vm334_vm1, %v658_v46, %v662_v47  ;;  %v740_v58 = vrot.slane %v1540_v44, 1  ;;  %v741_v59 = vrot.slane %v1875_v13, 1  ;;  %v1466_v13 = vld [vmem:[%s1798_s17 + $0x24] sm:$0xf]  ;;  %v184_v37 = vld [vmem:[%s1798_s17 + $0x48] sm:$0xf] }
  0x2a   : > { %562 = vrot.lane.b32.xlu1 %v1525_v12, %s1756_s18  ;;  %v1537_v61 = vcombine.low %v1457_v53, %v1868_v63  ;;  %v615_v62 = vsel %vm334_vm1, %v610_v51, %v614_v52  ;;  %v728_v0 = vrot.slane %v1536_v48, 1  ;;  %v729_v3 = vrot.slane %v1880_v20, 1  ;;  %v1955_v26 = vld [vmem:[%s1798_s17 + $0x20] ss:$0 sps:$4 sm:$0x11]  }
  0x2b   : > { %554 = vrot.lane.b32.xlu0 %v1521_v19, %s1756_s18  ;;  %v1548_v57 = vcombine.low %v1472_v54, %v1917_v1  ;;  %v1544_v6 = vcombine.low %v1464_v55, %v1925_v60  ;;  %v742_v10 = vsel %vm471_vm0, %v740_v58, %v741_v59  ;;  %v743_v63 = vrot.slane %v1541_v56, 1  ;;  %v1961_v34 = vld [vmem:[%s1798_s17 + $0x5c] ss:$0 sps:$4 sm:$0x11]   ;;  %v1970_v39 = vld [vmem:[%s1798_s17 + $0x4c] sm:$0xf] }
  0x2c   : > { %v744_v12 = vrot.slane %v1887_v24, 1  ;;  %v730_v15 = vsel %vm471_vm0, %v728_v0, %v729_v3  ;;  %v731_v16 = vrot.slane %v1537_v61, 1  ;;  %v732_v19 = vrot.slane %v1898_v11, 1  ;;  %v1966_v36 = vld [vmem:[%s1798_s17 + $0x2c] ss:$0 sps:$4 sm:$0x11]  }
  0x2d   : > { %v899_v20 = vshll.u32 %v1548_v57, 16  ;;  %v1549_v8 = vcombine.low %v1474_v7, %v1935_v9  ;;  %v851_v22 = vshll.u32 %v1544_v6, 16  ;;  %v1545_v24 = vcombine.low %v1466_v13, %v1942_v14  ;;  %v176_v40 = vld [vmem:[%s1798_s17 + $0x18] sm:$0xf]  ;;  %v1974_v17 = vld [vmem:[%s1798_s17 + $0x1c] sm:$0xf] }
  0x2e   : > { %696 = vrot.lane.b32.xlu1 %v651_v45, %s1759_s21  ;;  %v745_v25 = vsel %vm471_vm0, %v743_v63, %v744_v12  ;;  %v733_v27 = vsel %vm471_vm0, %v731_v16, %v732_v19  ;;  %v897_v29 = vshrl.u32 %v1548_v57, 16  ;;  %v904_v32 = vshll.u32 %v1948_v21, 16  ;;  %v1713_v41 = vld [vmem:[%s2357_s1] sm:$0xff]   ;;  %v1492_v42 = vld [vmem:[%s1798_s17 + $0x48] sm:$0xe] }
  0x2f   : > { %688 = vrot.lane.b32.xlu0 %v603_v50, %s1759_s21  ;;  %v911_v28 = vshll.u32 %v1549_v8, 16  ;;  %v901_v30 = vrot.slane %v899_v20, 1  ;;  %v863_v2 = vshll.u32 %v1545_v24, 16  ;;  %v849_v11 = vshrl.u32 %v1544_v6, 16  ;;  %v1488_v47 = vld [vmem:[%s1798_s17 + $0x18] sm:$0xe]  ;;  %1594 = vmatprep.subr.bf16.mxu0 %v1713_v41 }
  0x30   : > { %v853_v33 = vrot.slane %v851_v22, 1  ;;  %v856_v35 = vshll.u32 %v1955_v26, 16  ;;  %v906_v43 = vrot.slane %v904_v32, 1  ;;  %v909_v44 = vshrl.u32 %v1549_v8, 16  ;;  %1616 = vmatprep.subr.bf16.mxu1 %v1713_v41  ;;  %1595 = vmatpush3.bf16.msra.mxu0 %v1713_v41  ;;  %v1714_v56 = vld [vmem:[%s2357_s1 + $0x8] sm:$0xff]  }
  0x31   : > { %v902_v5 = vor.u32 %v901_v30, %v897_v29  ;;  %v913_v45 = vrot.slane %v911_v28, 1  ;;  %v916_v46 = vshll.u32 %v1961_v34, 16  ;;  %v861_v48 = vshrl.u32 %v1545_v24, 16  ;;  %1619 = vmatpush3.bf16.msra.mxu1 %v1713_v41  ;;  %v1998_v61 = vld [vmem:[%s1798_s17 + $0x50] ss:$0 sps:$4 sm:$0x11]   ;;  %1596 = vmatprep.subr.bf16.mxu0 %v1714_v56 }
  0x32   : > { %698 = vrot.lane.b32.xlu1 %v663_v4, %s1759_s21  ;;  %v865_v49 = vrot.slane %v863_v2, 1  ;;  %v868_v50 = vshll.u32 %v1966_v36, 16  ;;  %v1986_v51 = vcombine.low %v184_v37, %v1970_v39  ;;  %v854_v52 = vor.u32 %v853_v33, %v849_v11  ;;  %v186_v7 = vld [vmem:[%s1798_s17 + $0x54] sm:$0xf]  ;;  %1617 = vmatprep.subr.bf16.mxu1 %v1714_v56  ;;  %v178_v13 = vld [vmem:[%s1798_s17 + $0x24] sm:$0xf] }
  0x33   : > { %690 = vrot.lane.b32.xlu0 %v615_v62, %s1759_s21  ;;  %v858_v53 = vrot.slane %v856_v35, 1  ;;  %v1989_v54 = vcombine.low %v176_v40, %v1974_v17  ;;  %v1564_v55 = vcombine.low %v1492_v42, %v1917_v1  ;;  %v1560_v4 = vcombine.low %v1488_v47, %v1925_v60  ;;  %v1493_v16 = vld [vmem:[%s1798_s17 + $0x54] sm:$0xe]  ;;  %v2040_v40 = vld [vmem:[%s1798_s17 + $0x5c] ss:$0 sps:$4 sm:$0x11]  }
  0x34   : > { %v914_v58 = vor.u32 %v913_v45, %v909_v44  ;;  %v918_v59 = vrot.slane %v916_v46, 1  ;;  %v907_v1 = vsel %vm334_vm1, %v902_v5, %v906_v43  ;;  %v866_v62 = vor.u32 %v865_v49, %v861_v48  ;;  %1597 = vmatpush3.bf16.msra.mxu0 %v1714_v56 }
  0x35   : > { %v870_v0 = vrot.slane %v868_v50, 1  ;;  %v410_v3 = vshll.u32 %v1986_v51, 16  ;;  %v859_v60 = vsel %vm334_vm1, %v854_v52, %v858_v53  ;;  %v996_v63 = vrot.slane %v1564_v55, 1  ;;  %1620 = vmatpush3.bf16.msra.mxu1 %v1714_v56  ;;  %v202_v53 = vld [vmem:[%s1798_s17 + $0x48] sm:$0xe] }
  0x36   : > { %760 = vrot.lane.b32.xlu1 %v742_v10, %s1760_s22  ;;  %v2010_v10 = vld [vmem:[%s1798_s17 + $0x58] sm:$0xf]  ;;  %v997_v12 = vrot.slane %v1948_v21, 1  ;;  %v919_v19 = vsel %vm334_vm1, %v914_v58, %v918_v59  ;;  %v984_v20 = vrot.slane %v1560_v4, 1  ;;  %v415_v22 = vshll.u32 %v1998_v61, 16 }
  0x37   : > { %752 = vrot.lane.b32.xlu0 %v730_v15, %s1760_s22  ;;  %v2015_v15 = vld [vmem:[%s1798_s17 + $0x28] sm:$0xf]  ;;  %v871_v21 = vsel %vm334_vm1, %v866_v62, %v870_v0  ;;  %v2027_v28 = vcombine.low %v186_v7, %v2010_v10  ;;  %v360_v29 = vshrl.u32 %v1989_v54, 16  ;;  %v1565_v2 = vcombine.low %v1493_v16, %v1935_v9  ;;  %v2045_v9 = vld [vmem:[%s1798_s17 + $0x2c] ss:$0 sps:$4 sm:$0x11]  }
  0x38   : > { %v2032_v32 = vcombine.low %v178_v13, %v2015_v15  ;;  %v417_v33 = vrot.slane %v415_v22, 1  ;;  %v998_v35 = vsel %vm471_vm0, %v996_v63, %v997_v12  ;;  %v1000_v45 = vrot.slane %v1961_v34, 1  ;;  %v203_v7 = vld [vmem:[%s1798_s17 + $0x54] sm:$0xe]  ;;  %v199_v63 = vld [vmem:[%s1798_s17 + $0x24] sm:$0xe] }
  0x39   : > { %v422_v5 = vshll.u32 %v2027_v28, 16  ;;  %v999_v44 = vrot.slane %v1565_v2, 1  ;;  %v988_v47 = vrot.slane %v1966_v36, 1  ;;  %v420_v49 = vshrl.u32 %v2027_v28, 16  ;;  %v198_v36 = vld [vmem:[%s1798_s17 + $0x18] sm:$0xe] }
  0x3a   : > { %762 = vrot.lane.b32.xlu1 %v745_v25, %s1760_s22  ;;  %v408_v25 = vshrl.u32 %v1986_v51, 16  ;;  %v427_v52 = vshll.u32 %v2040_v40, 16  ;;  %v372_v56 = vshrl.u32 %v2032_v32, 16  ;;  %v379_v4 = vshll.u32 %v2045_v9, 16 }
  0x3b   : > { %754 = vrot.lane.b32.xlu0 %v733_v27, %s1760_s22  ;;  %v412_v27 = vrot.slane %v410_v3, 1  ;;  %v424_v50 = vrot.slane %v422_v5, 1  ;;  %v1001_v58 = vsel %vm471_vm0, %v999_v44, %v1000_v45  ;;  %v1518_v62 = vcombine.low %v202_v53, %v1970_v39  ;;  %v1715_v5 = vld [vmem:[%s2357_s1 + $0x10] ss:$0 sps:$4 sm:$0x33]  }
  0x3c   : > { %v1514_v0 = vcombine.low %v198_v36, %v1974_v17  ;;  %v491_v12 = vrot.slane %v1998_v61, 1  ;;  %v1515_v61 = vcombine.low %v199_v63, %v2015_v15  ;;  %v2092_v15 = vld [vmem:[%s1798_s17 + $0x64] sm:$0xf]  ;;  %v2113_v44 = vld [vmem:[%s1798_s17 + $0x2c] ss:$0 sps:$4 sm:$0x11]   ;;  %1622 = vmatprep.subr.msk.bf16.mxu0 %vm1204_vm2, %v1715_v5  ;;  %1623 = vmatprep.subr.msk.bf16.mxu1 %vm1204_vm2, %v1715_v5 }
  0x3d   : > { %v413_v37 = vor.u32 %v412_v27, %v408_v25  ;;  %v425_v59 = vor.u32 %v424_v50, %v420_v49  ;;  %v490_v16 = vrot.slane %v1518_v62, 1  ;;  %v494_v27 = vrot.slane %v2040_v40, 1  ;;  %v2119_v53 = vld [vmem:[%s1798_s17 + $0x68] ss:$0 sps:$4 sm:$0x11]  }
  0x3e   : > { %816 = vrot.lane.b32.xlu1 %v1548_v57, %s1761_s25  ;;  %v2004_v57 = vld [vmem:[%s1798_s17 + $0x20] ss:$0 sps:$4 sm:$0x11]   ;;  %v478_v17 = vrot.slane %v1514_v0, 1  ;;  %v481_v2 = vrot.slane %v1515_v61, 1  ;;  %v684_v62 = vshll.u32 %v2119_v53, 16 }
  0x3f   : > { %808 = vrot.lane.b32.xlu0 %v1544_v6, %s1761_s25  ;;  %v362_v6 = vshll.u32 %v1989_v54, 16  ;;  %v418_v48 = vsel %vm334_vm1, %v413_v37, %v417_v33  ;;  %v479_v13 = vrot.slane %v2004_v57, 1  ;;  %v1438_v33 = vld [vmem:[%s1798_s17 + $0x30] sm:$0xf]  ;;  %v1462_v0 = vld [vmem:[%s1798_s17 + $0x54] sm:$0xe] }
  0x40   : > { %v1458_v63 = vld [vmem:[%s1798_s17 + $0x24] sm:$0xe] }
  0x41   : > { %v364_v30 = vrot.slane %v362_v6, 1  ;;  %v381_v6 = vrot.slane %v379_v4, 1 }
  0x42   : > { %818 = vrot.lane.b32.xlu1 %v1549_v8, %s1761_s25  ;;  %v985_v8 = vrot.slane %v1955_v26, 1  ;;  %v367_v26 = vshll.u32 %v2004_v57, 16  ;;  %v1436_v57 = vld [vmem:[%s1798_s17 + $0x24] sm:$0xf] }
  0x43   : > { %810 = vrot.lane.b32.xlu0 %v1545_v24, %s1761_s25  ;;  %v1489_v24 = vld [vmem:[%s1798_s17 + $0x24] sm:$0xe]  ;;  %v365_v42 = vor.u32 %v364_v30, %v360_v29  ;;  %v1446_v30 = vld [vmem:[%s1798_s17 + $0x60] sm:$0xf] }
  0x44   : > { %v1561_v11 = vcombine.low %v1489_v24, %v1942_v14  ;;  %v986_v41 = vsel %vm471_vm0, %v984_v20, %v985_v8  ;;  %v369_v43 = vrot.slane %v367_v26, 1  ;;  %v374_v14 = vshll.u32 %v2032_v32, 16  ;;  %v1444_v20 = vld [vmem:[%s1798_s17 + $0x54] sm:$0xf]  ;;  %v2076_v8 = vld [vmem:[%s1798_s17 + $0x58] sm:$0xf] }
  0x45   : > { %v2082_v24 = vld [vmem:[%s1798_s17 + $0x28] sm:$0xf]  ;;  %v480_v26 = vsel %vm471_vm0, %v478_v17, %v479_v13  ;;  %v1527_v40 = vcombine.low %v1446_v30, %v2092_v15 }
  0x46   : > { %952 = vrot.lane.b32.xlu1 %v907_v1, %s1762_s28  ;;  %v987_v46 = vrot.slane %v1561_v11, 1  ;;  %v370_v55 = vsel %vm334_vm1, %v365_v42, %v369_v43  ;;  %v376_v34 = vrot.slane %v374_v14, 1  ;;  %v429_v1 = vrot.slane %v427_v52, 1  ;;  %v2108_v43 = vld [vmem:[%s1798_s17 + $0x5c] ss:$0 sps:$4 sm:$0x11]  }
  0x47   : > { %944 = vrot.lane.b32.xlu0 %v859_v60, %s1762_s28  ;;  %v1522_v29 = vcombine.low %v1436_v57, %v2082_v24  ;;  %v482_v11 = vrot.slane %v2045_v9, 1  ;;  %v679_v45 = vshll.u32 %v1527_v40, 16  ;;  %v672_v49 = vshll.u32 %v2108_v43, 16  ;;  %v1459_v57 = vld [vmem:[%s1798_s17 + $0x30] sm:$0xe] }
  0x48   : > { %v989_v3 = vsel %vm471_vm0, %v987_v46, %v988_v47  ;;  %v377_v60 = vor.u32 %v376_v34, %v372_v56  ;;  %v430_v39 = vsel %vm334_vm1, %v425_v59, %v429_v1  ;;  %v624_v56 = vshll.u32 %v2113_v44, 16  ;;  %v2123_v34 = vld [vmem:[%s1798_s17 + $0x38] ss:$0 sps:$4 sm:$0x11]  }
  0x49   : > { %v619_v42 = vshll.u32 %v1522_v29, 16  ;;  %v483_v9 = vsel %vm471_vm0, %v481_v2, %v482_v11  ;;  %v617_v50 = vshrl.u32 %v1522_v29, 16  ;;  %v677_v36 = vshrl.u32 %v1527_v40, 16  ;;  %v1468_v2 = vld [vmem:[%s1798_s17 + $0x30] sm:$0xf] }
  0x4a   : > { %954 = vrot.lane.b32.xlu1 %v919_v19, %s1762_s28  ;;  %v1519_v19 = vcombine.low %v203_v7, %v2010_v10  ;;  %v382_v22 = vsel %vm334_vm1, %v377_v60, %v381_v6  ;;  %v492_v10 = vsel %vm471_vm0, %v490_v16, %v491_v12  ;;  %v681_v1 = vrot.slane %v679_v45, 1  ;;  %v2153_v11 = vld [vmem:[%s1798_s17 + $0x34] sm:$0xf]  ;;  %v2169_v45 = vld [vmem:[%s1798_s17 + $0x40] sm:$0xf] }
  0x4b   : > { %946 = vrot.lane.b32.xlu0 %v871_v21, %s1762_s28  ;;  %v1526_v21 = vcombine.low %v1444_v20, %v2076_v8  ;;  %v621_v52 = vrot.slane %v619_v42, 1  ;;  %v636_v7 = vshll.u32 %v2123_v34, 16  ;;  %v1542_v12 = vcombine.low %v1462_v0, %v2076_v8  ;;  %v2163_v42 = vld [vmem:[%s1798_s17 + $0x70] sm:$0xf] }
  0x4c   : > { %v493_v25 = vrot.slane %v1519_v19, 1  ;;  %v686_v16 = vrot.slane %v684_v62, 1  ;;  %v1538_v17 = vcombine.low %v1458_v63, %v2082_v24  ;;  %v1463_v19 = vld [vmem:[%s1798_s17 + $0x60] sm:$0xe] }
  0x4d   : > { %v667_v37 = vshll.u32 %v1526_v21, 16  ;;  %v665_v46 = vshrl.u32 %v1526_v21, 16  ;;  %v622_v59 = vor.u32 %v621_v52, %v617_v50  ;;  %v638_v61 = vrot.slane %v636_v7, 1  ;;  %v1476_v24 = vld [vmem:[%s1798_s17 + $0x60] sm:$0xf] }
  0x4e   : > { %1016 = vrot.lane.b32.xlu1 %v998_v35, %s1763_s29  ;;  %v2098_v35 = vld [vmem:[%s1798_s17 + $0x34] sm:$0xf]  ;;  %v1543_v8 = vcombine.low %v1463_v19, %v2092_v15  ;;  %v735_v15 = vrot.slane %v2113_v44, 1  ;;  %v1470_v44 = vld [vmem:[%s1798_s17 + $0x3c] sm:$0xf] }
  0x4f   : > { %1008 = vrot.lane.b32.xlu0 %v986_v41, %s1763_s29  ;;  %v495_v41 = vsel %vm471_vm0, %v493_v25, %v494_v27  ;;  %v1523_v14 = vcombine.low %v1438_v33, %v2098_v35  ;;  %v669_v47 = vrot.slane %v667_v37, 1  ;;  %v747_v25 = vrot.slane %v2108_v43, 1  ;;  %v2146_v27 = vld [vmem:[%s1798_s17 + $0x64] sm:$0xf] }
  0x50   : > { %v1550_v33 = vcombine.low %v1476_v24, %v2146_v27  ;;  %v1709_v50 = vld [vmem:[%s1798_s17 + $0x68] ss:$0 sps:$4 sm:$0x11]  }
  0x51   : > { %v670_v4 = vor.u32 %v669_v47, %v665_v46  ;;  %v629_v60 = vshrl.u32 %v1523_v14, 16 }
  0x52   : > { %443 = vrot.lane.b32.xlu1 %v418_v48, %s1758_s20  ;;  %v1206_v48 = vsel %vm1204_vm2, %v1715_v5, 0  ;;  %v1546_v5 = vcombine.low %v1468_v2, %v2153_v11  ;;  %v923_v46 = vshll.u32 %v1550_v33, 16 }
  0x53   : > { %435 = vrot.lane.b32.xlu0 %v370_v55, %s1758_s20  ;;  %v631_v55 = vshll.u32 %v1523_v14, 16  ;;  %1599 = vmatpush3.bf16.msra.mxu0 %v1206_v48 }
  0x54   : > { %1621 = vmatpush3.bf16.msra.mxu1 %v1206_v48 }
  0x55   : > { %v633_v6 = vrot.slane %v631_v55, 1  ;;  %v1710_v55 = vld [vmem:[%s1798_s17 + $0x38] ss:$0 sps:$4 sm:$0x11]  }
  0x56   : > { %1018 = vrot.lane.b32.xlu1 %v1001_v58, %s1763_s29  ;;  %v674_v58 = vrot.slane %v672_v49, 1  ;;  %v875_v49 = vshll.u32 %v1546_v5, 16  ;;  %v880_v0 = vshll.u32 %v1710_v55, 16 }
  0x57   : > { %1010 = vrot.lane.b32.xlu0 %v989_v3, %s1763_s29  ;;  %v626_v3 = vrot.slane %v624_v56, 1 }
  0x58   : > { %v675_v13 = vsel %vm334_vm1, %v670_v4, %v674_v58  ;;  %v925_v4 = vrot.slane %v923_v46, 1  ;;  %v873_v58 = vshrl.u32 %v1546_v5, 16 }
  0x59   : > { %v627_v20 = vsel %vm334_vm1, %v622_v59, %v626_v3  ;;  %v877_v59 = vrot.slane %v875_v49, 1  ;;  %v1712_v3 = vld [vmem:[%s1798_s17 + $0x44] ss:$0 sps:$4 sm:$0x11]  }
  0x5a   : > { %445 = vrot.lane.b32.xlu1 %v430_v39, %s1758_s20  ;;  %v682_v39 = vor.u32 %v681_v1, %v677_v36  ;;  %v928_v36 = vshll.u32 %v1709_v50, 16  ;;  %v1711_v1 = vld [vmem:[%s1798_s17 + $0x74] ss:$0 sps:$4 sm:$0x11]  }
  0x5b   : > { %437 = vrot.lane.b32.xlu0 %v382_v22, %s1758_s20  ;;  %v634_v22 = vor.u32 %v633_v6, %v629_v60  ;;  %v878_v63 = vor.u32 %v877_v59, %v873_v58 }
  0x5c   : > { %v930_v7 = vrot.slane %v928_v36, 1 }
  0x5d   : > { %v639_v30 = vsel %vm334_vm1, %v634_v22, %v638_v61  ;;  %v1490_v22 = vld [vmem:[%s1798_s17 + $0x30] sm:$0xe] }
  0x5e   : > { %508 = vrot.lane.b32.xlu1 %v492_v10, %s1757_s19  ;;  %v746_v10 = vrot.slane %v1542_v12, 1 }
  0x5f   : > { %500 = vrot.lane.b32.xlu0 %v480_v26, %s1757_s19  ;;  %v734_v26 = vrot.slane %v1538_v17, 1 }
  0x60   : > { %v748_v37 = vsel %vm471_vm0, %v746_v10, %v747_v25  ;;  %v1562_v10 = vcombine.low %v1490_v22, %v2153_v11  ;;  %v1495_v25 = vld [vmem:[%s1798_s17 + $0x6c] sm:$0xe] }
  0x61   : > { %v736_v43 = vsel %vm471_vm0, %v734_v26, %v735_v15  ;;  %v1491_v15 = vld [vmem:[%s1798_s17 + $0x3c] sm:$0xe] }
  0x62   : > { %510 = vrot.lane.b32.xlu1 %v495_v41, %s1757_s19  ;;  %v1478_v41 = vld [vmem:[%s1798_s17 + $0x6c] sm:$0xf]  ;;  %v1563_v11 = vcombine.low %v1491_v15, %v2169_v45 }
  0x63   : > { %502 = vrot.lane.b32.xlu0 %v483_v9, %s1757_s19  ;;  %v1551_v47 = vcombine.low %v1478_v41, %v2163_v42  ;;  %v991_v41 = vrot.slane %v1710_v55, 1 }
  0x65   : > { %v935_v56 = vshll.u32 %v1551_v47, 16  ;;  %v933_v6 = vshrl.u32 %v1551_v47, 16 }
  0x66   : > { %564 = vrot.lane.b32.xlu1 %v1526_v21, %s1756_s18  ;;  %v687_v21 = vsel %vm334_vm1, %v682_v39, %v686_v16  ;;  %v1494_v39 = vld [vmem:[%s1798_s17 + $0x60] sm:$0xe]  ;;  %v882_v16 = vrot.slane %v880_v0, 1 }
  0x67   : > { %556 = vrot.lane.b32.xlu0 %v1522_v29, %s1756_s18  ;;  %v1539_v29 = vcombine.low %v1459_v57, %v2098_v35  ;;  %v750_v35 = vrot.slane %v2119_v53, 1  ;;  %v1547_v53 = vcombine.low %v1470_v44, %v2169_v45  ;;  %v937_v12 = vrot.slane %v935_v56, 1 }
  0x68   : > { %v1566_v61 = vcombine.low %v1494_v39, %v2146_v27  ;;  %v883_v24 = vsel %vm334_vm1, %v878_v63, %v882_v16  ;;  %v1567_v27 = vcombine.low %v1495_v25, %v2163_v42 }
  0x69   : > { %v737_v9 = vrot.slane %v1539_v29, 1  ;;  %v887_v62 = vshll.u32 %v1547_v53, 16  ;;  %v885_v17 = vshrl.u32 %v1547_v53, 16 }
  0x6a   : > { %566 = vrot.lane.b32.xlu1 %v1527_v40, %s1756_s18  ;;  %v749_v40 = vrot.slane %v1543_v8, 1  ;;  %v938_v8 = vor.u32 %v937_v12, %v933_v6  ;;  %v1005_v42 = vrot.slane %v1567_v27, 1 }
  0x6b   : > { %558 = vrot.lane.b32.xlu0 %v1523_v14, %s1756_s18  ;;  %v738_v14 = vrot.slane %v2123_v34, 1  ;;  %v921_v34 = vshrl.u32 %v1550_v33, 16  ;;  %v889_v19 = vrot.slane %v887_v62, 1 }
  0x6c   : > { %v751_v48 = vsel %vm471_vm0, %v749_v40, %v750_v35  ;;  %v1003_v40 = vrot.slane %v1709_v50, 1 }
  0x6d   : > { %v739_v52 = vsel %vm471_vm0, %v737_v9, %v738_v14  ;;  %v926_v60 = vor.u32 %v925_v4, %v921_v34  ;;  %v1006_v14 = vrot.slane %v1711_v1, 1 }
  0x6e   : > { %700 = vrot.lane.b32.xlu1 %v675_v13, %s1759_s21  ;;  %v940_v13 = vshll.u32 %v1711_v1, 16 }
  0x6f   : > { %692 = vrot.lane.b32.xlu0 %v627_v20, %s1759_s21  ;;  %v892_v20 = vshll.u32 %v1712_v3, 16  ;;  %v931_v57 = vsel %vm334_vm1, %v926_v60, %v930_v7  ;;  %v1007_v49 = vsel %vm471_vm0, %v1005_v42, %v1006_v14 }
  0x71   : > { %v894_v26 = vrot.slane %v892_v20, 1 }
  0x72   : > { %702 = vrot.lane.b32.xlu1 %v687_v21, %s1759_s21  ;;  %v942_v21 = vrot.slane %v940_v13, 1 }
  0x73   : > { %694 = vrot.lane.b32.xlu0 %v639_v30, %s1759_s21  ;;  %v890_v30 = vor.u32 %v889_v19, %v885_v17 }
  0x75   : > { %v895_v35 = vsel %vm334_vm1, %v890_v30, %v894_v26 }
  0x76   : > { %764 = vrot.lane.b32.xlu1 %v748_v37, %s1760_s22  ;;  %v1002_v37 = vrot.slane %v1566_v61, 1 }
  0x77   : > { %756 = vrot.lane.b32.xlu0 %v736_v43, %s1760_s22 }
  0x78   : > { %v1004_v9 = vsel %vm471_vm0, %v1002_v37, %v1003_v40 }
  0x7a   : > { %766 = vrot.lane.b32.xlu1 %v751_v48, %s1760_s22  ;;  %v994_v48 = vrot.slane %v1712_v3, 1 }
  0x7b   : > { %758 = vrot.lane.b32.xlu0 %v739_v52, %s1760_s22 }
  0x7e   : > { %820 = vrot.lane.b32.xlu1 %v1550_v33, %s1761_s25  ;;  %v943_v33 = vsel %vm334_vm1, %v938_v8, %v942_v21 }
  0x7f   : > { %812 = vrot.lane.b32.xlu0 %v1546_v5, %s1761_s25  ;;  %v990_v5 = vrot.slane %v1562_v10, 1 }
  0x81   : > { %v992_v46 = vsel %vm471_vm0, %v990_v5, %v991_v41 }
  0x82   : > { %822 = vrot.lane.b32.xlu1 %v1551_v47, %s1761_s25  ;;  %v993_v47 = vrot.slane %v1563_v11, 1 }
  0x83   : > { %814 = vrot.lane.b32.xlu0 %v1547_v53, %s1761_s25 }
  0x84   : > { %v995_v50 = vsel %vm471_vm0, %v993_v47, %v994_v48 }
  0x86   : > { %v2194_v29 = vpop.permute.xlu1 %560  ;;  %956 = vrot.lane.b32.xlu1 %v931_v57, %s1762_s28 }
  0x87   : > { %v553_v2 = vpop.permute.xlu0 %552  ;;  %948 = vrot.lane.b32.xlu0 %v883_v24, %s1762_s28 }
  0x8a   : > { %958 = vrot.lane.b32.xlu1 %v943_v33, %s1762_s28 }
  0x8b   : > { %v505_v43 = vpop.permute.xlu1 %504  ;;  %950 = vrot.lane.b32.xlu0 %v895_v35, %s1762_s28 }
  0x8c   : > { %v497_v44 = vpop.permute.xlu0 %496 }
  0x8e   : > { %1020 = vrot.lane.b32.xlu1 %v1004_v9, %s1763_s29 }
  0x8f   : > { %v507_v45 = vpop.permute.xlu1 %506  ;;  %1012 = vrot.lane.b32.xlu0 %v992_v46, %s1763_s29 }
  0x91   : > { %v499_v52 = vpop.permute.xlu0 %498 }
  0x92   : > { %1022 = vrot.lane.b32.xlu1 %v1007_v49, %s1763_s29 }
  0x93   : > { %1014 = vrot.lane.b32.xlu0 %v995_v50, %s1763_s29 }
  0x94   : > { %v434_v53 = vpop.permute.xlu1 %433 }
  0x95   : > { %v432_v55 = vpop.permute.xlu0 %431 }
  0x96   : > { %v1026_v16 = vsel %vm1024_vm3, %v1835_v23, %v432_v55 }
  0x97   : > { %v1043_v22 = vsel %vm1041_vm4, %v1026_v16, %v497_v44 }
  0x98   : > { %v442_v56 = vpop.permute.xlu1 %441  ;;  %v1060_v8 = vsel %vm1058_vm5, %v1043_v22, %v553_v2  ;;  %v1028_v2 = vsel %vm1024_vm3, %v1848_v38, %v434_v53 }
  0x99   : > { %v440_v34 = vpop.permute.xlu0 %439  ;;  %v1045_v35 = vsel %vm1041_vm4, %v1028_v2, %v499_v52 }
  0x9a   : > { %v1034_v39 = vsel %vm1024_vm3, %v1830_v18, %v440_v34 }
  0x9b   : > { %v1051_v19 = vsel %vm1041_vm4, %v1034_v39, %v505_v43 }
  0x9c   : > { %v563_v4 = vpop.permute.xlu1 %562  ;;  %v1068_v61 = vsel %vm1058_vm5, %v1051_v19, %v2194_v29  ;;  %v1036_v29 = vsel %vm1024_vm3, %v1842_v31, %v442_v56 }
  0x9d   : > { %v555_v36 = vpop.permute.xlu0 %554  ;;  %v1053_v11 = vsel %vm1041_vm4, %v1036_v29, %v507_v45 }
  0x9e   : > { %v1070_v31 = vsel %vm1058_vm5, %v1053_v11, %v563_v4  ;;  %v1062_v38 = vsel %vm1058_vm5, %v1045_v35, %v555_v36 }
  0xa0   : > { %v697_v58 = vpop.permute.xlu1 %696 }
  0xa1   : > { %v689_v59 = vpop.permute.xlu0 %688  ;;  %v1085_v18 = vsel %vm1075_vm6, %v1068_v61, %v697_v58 }
  0xa2   : > { %v1077_v21 = vsel %vm1075_vm6, %v1060_v8, %v689_v59 }
  0xa4   : > { %v699_v1 = vpop.permute.xlu1 %698 }
  0xa5   : > { %v691_v62 = vpop.permute.xlu0 %690  ;;  %v1087_v41 = vsel %vm1075_vm6, %v1070_v31, %v699_v1 }
  0xa6   : > { %v1079_v9 = vsel %vm1075_vm6, %v1062_v38, %v691_v62 }
  0xa8   : > { %v761_v0 = vpop.permute.xlu1 %760 }
  0xa9   : > { %v753_v3 = vpop.permute.xlu0 %752  ;;  %v1102_v10 = vsel %vm1092_vm7, %v1085_v18, %v761_v0 }
  0xaa   : > { %v1094_v25 = vsel %vm1092_vm7, %v1077_v21, %v753_v3 }
  0xac   : > { %v763_v60 = vpop.permute.xlu1 %762 }
  0xad   : > { %v755_v6 = vpop.permute.xlu0 %754  ;;  %v1104_v42 = vsel %vm1092_vm7, %v1087_v41, %v763_v60 }
  0xae   : > { %v1096_v14 = vsel %vm1092_vm7, %v1079_v9, %v755_v6 }
  0xb0   : > { %v817_v7 = vpop.permute.xlu1 %816 }
  0xb1   : > { %v809_v63 = vpop.permute.xlu0 %808  ;;  %v1119_v24 = vsel %vm1109_vm8, %v1102_v10, %v817_v7 }
  0xb2   : > { %v1111_v30 = vsel %vm1109_vm8, %v1094_v25, %v809_v63 }
  0xb4   : > { %v819_v12 = vpop.permute.xlu1 %818 }
  0xb5   : > { %v811_v13 = vpop.permute.xlu0 %810  ;;  %v1121_v44 = vsel %vm1109_vm8, %v1104_v42, %v819_v12 }
  0xb6   : > { %v1113_v46 = vsel %vm1109_vm8, %v1096_v14, %v811_v13 }
  0xb8   : > { %v953_v17 = vpop.permute.xlu1 %952 }
  0xb9   : > { %v945_v20 = vpop.permute.xlu0 %944  ;;  %v1136_v26 = vsel %vm1126_vm9, %v1119_v24, %v953_v17 }
  0xba   : > { %v1128_v27 = vsel %vm1126_vm9, %v1111_v30, %v945_v20 }
  0xbc   : > { %v955_v57 = vpop.permute.xlu1 %954 }
  0xbd   : > { %v947_v23 = vpop.permute.xlu0 %946  ;;  %v1138_v47 = vsel %vm1126_vm9, %v1121_v44, %v955_v57 }
  0xbe   : > { %v1130_v45 = vsel %vm1126_vm9, %v1113_v46, %v947_v23 }
  0xc0   : > { %v1017_v15 = vpop.permute.xlu1 %1016 }
  0xc1   : > { %v1009_v33 = vpop.permute.xlu0 %1008  ;;  %v1153_v37 = vsel %vm1143_vm10, %v1136_v26, %v1017_v15 }
  0xc2   : > { %v1145_v40 = vsel %vm1143_vm10, %v1128_v27, %v1009_v33  ;;  %1608 = vmatprep.mubr.msk.bf16.mxu1 %vm1187_vm11, %v1153_v37 }
  0xc3   : > { %1600 = vmatprep.mubr.msk.bf16.mxu0 %vm1187_vm11, %v1145_v40 }
  0xc4   : > { %v444_v5 = vpop.permute.xlu1 %443 }
  0xc5   : > { %v436_v43 = vpop.permute.xlu0 %435  ;;  %v1038_v61 = vsel %vm1024_vm3, %v1986_v51, %v444_v5 }
  0xc6   : > { %v1030_v57 = vsel %vm1024_vm3, %v1989_v54, %v436_v43 }
  0xc8   : > { %v1019_v48 = vpop.permute.xlu1 %1018 }
  0xc9   : > { %v1155_v49 = vsel %vm1143_vm10, %v1138_v47, %v1019_v48  ;;  %v1011_v50 = vpop.permute.xlu0 %1010 }
  0xca   : > { %v1147_v52 = vsel %vm1143_vm10, %v1130_v45, %v1011_v50  ;;  %1609 = vmatmul.mubr.msk.bf16.vlgmr.msra.gmra.mrb[0].mxu1 %vm1187_vm11, %v1155_v49  ;;  %v2297_v50 = vld [vmem:[%s2358_s2] ss:$0 sm:$0xff] }
  0xcb   : > { %1601 = vmatmul.mubr.msk.bf16.vlgmr.msra.gmra.mrb[0].mxu0 %vm1187_vm11, %v1147_v52 }
  0xcc   : > { %v446_v53 = vpop.permute.xlu1 %445 }
  0xcd   : > { %v438_v55 = vpop.permute.xlu0 %437  ;;  %v1040_v29 = vsel %vm1024_vm3, %v2027_v28, %v446_v53 }
  0xce   : > { %v1032_v54 = vsel %vm1024_vm3, %v2032_v32, %v438_v55 }
  0xd0   : > { %v509_v56 = vpop.permute.xlu1 %508 }
  0xd1   : > { %v501_v34 = vpop.permute.xlu0 %500  ;;  %v1055_v18 = vsel %vm1041_vm4, %v1038_v61, %v509_v56 }
  0xd2   : > { %v1047_v8 = vsel %vm1041_vm4, %v1030_v57, %v501_v34 }
  0xd4   : > { %v511_v4 = vpop.permute.xlu1 %510 }
  0xd5   : > { %v503_v36 = vpop.permute.xlu0 %502  ;;  %v1057_v26 = vsel %vm1041_vm4, %v1040_v29, %v511_v4 }
  0xd6   : > { %v1049_v27 = vsel %vm1041_vm4, %v1032_v54, %v503_v36 }
  0xd8   : > { %v565_v58 = vpop.permute.xlu1 %564 }
  0xd9   : > { %v557_v59 = vpop.permute.xlu0 %556  ;;  %v1072_v23 = vsel %vm1058_vm5, %v1055_v18, %v565_v58 }
  0xda   : > { %v1064_v10 = vsel %vm1058_vm5, %v1047_v8, %v557_v59 }
  0xdc   : > { %v567_v1 = vpop.permute.xlu1 %566 }
  0xdd   : > { %v559_v62 = vpop.permute.xlu0 %558  ;;  %v1074_v33 = vsel %vm1058_vm5, %v1057_v26, %v567_v1 }
  0xde   : > { %v1066_v11 = vsel %vm1058_vm5, %v1049_v27, %v559_v62 }
  0xe0   : > { %v701_v0 = vpop.permute.xlu1 %700 }
  0xe1   : > { %v693_v3 = vpop.permute.xlu0 %692  ;;  %v1089_v25 = vsel %vm1075_vm6, %v1072_v23, %v701_v0 }
  0xe2   : > { %v1081_v51 = vsel %vm1075_vm6, %v1064_v10, %v693_v3 }
  0xe4   : > { %v703_v60 = vpop.permute.xlu1 %702 }
  0xe5   : > { %v695_v6 = vpop.permute.xlu0 %694  ;;  %v1091_v31 = vsel %vm1075_vm6, %v1074_v33, %v703_v60 }
  0xe6   : > { %v1083_v38 = vsel %vm1075_vm6, %v1066_v11, %v695_v6 }
  0xe8   : > { %v765_v7 = vpop.permute.xlu1 %764 }
  0xe9   : > { %v757_v63 = vpop.permute.xlu0 %756  ;;  %v1106_v30 = vsel %vm1092_vm7, %v1089_v25, %v765_v7 }
  0xea   : > { %v1098_v15 = vsel %vm1092_vm7, %v1081_v51, %v757_v63 }
  0xec   : > { %v767_v12 = vpop.permute.xlu1 %766 }
  0xed   : > { %v759_v13 = vpop.permute.xlu0 %758  ;;  %v1108_v41 = vsel %vm1092_vm7, %v1091_v31, %v767_v12 }
  0xee   : > { %v1100_v9 = vsel %vm1092_vm7, %v1083_v38, %v759_v13 }
  0xf0   : > { %v821_v39 = vpop.permute.xlu1 %820 }
  0xf1   : > { %v813_v16 = vpop.permute.xlu0 %812  ;;  %v1123_v2 = vsel %vm1109_vm8, %v1106_v30, %v821_v39 }
  0xf2   : > { %v1115_v37 = vsel %vm1109_vm8, %v1098_v15, %v813_v16 }
  0xf4   : > { %v823_v17 = vpop.permute.xlu1 %822 }
  0xf5   : > { %v815_v19 = vpop.permute.xlu0 %814  ;;  %v1125_v42 = vsel %vm1109_vm8, %v1108_v41, %v823_v17 }
  0xf6   : > { %v1117_v14 = vsel %vm1109_vm8, %v1100_v9, %v815_v19 }
  0xf8   : > { %v957_v20 = vpop.permute.xlu1 %956 }
  0xf9   : > { %v949_v22 = vpop.permute.xlu0 %948  ;;  %v1140_v28 = vsel %vm1126_vm9, %v1123_v2, %v957_v20 }
  0xfa   : > { %v1132_v32 = vsel %vm1126_vm9, %v1115_v37, %v949_v22 }
  0xfc   : > { %v959_v21 = vpop.permute.xlu1 %958 }
  0xfd   : > { %v951_v24 = vpop.permute.xlu0 %950  ;;  %v1142_v44 = vsel %vm1126_vm9, %v1125_v42, %v959_v21 }
  0xfe   : > { %v1134_v47 = vsel %vm1126_vm9, %v1117_v14, %v951_v24 }
 0x100   : > { %v1021_v40 = vpop.permute.xlu1 %1020 }
 0x101   : > { %v1157_v35 = vsel %vm1143_vm10, %v1140_v28, %v1021_v40  ;;  %v1013_v5 = vpop.permute.xlu0 %1012 }
 0x102   : > { %v1149_v43 = vsel %vm1143_vm10, %v1132_v32, %v1013_v5  ;;  %1612 = vmatprep.mubr.msk.bf16.mxu1 %vm1187_vm11, %v1157_v35 }
 0x103   : > { %1604 = vmatprep.mubr.msk.bf16.mxu0 %vm1187_vm11, %v1149_v43 }
 0x104   : > { %v1023_v46 = vpop.permute.xlu1 %1022 }
 0x105   : > { %v1159_v48 = vsel %vm1143_vm10, %v1142_v44, %v1023_v46  ;;  %v1015_v45 = vpop.permute.xlu0 %1014 }
 0x106   : > { %v1151_v49 = vsel %vm1143_vm10, %v1134_v47, %v1015_v45  ;;  %1613 = vmatmul.mubr.msk.bf16.gmra.mrb[4].mxu1 %vm1187_vm11, %v1159_v48 }
 0x107   : > { %1605 = vmatmul.mubr.msk.bf16.gmra.mrb[4].mxu0 %vm1187_vm11, %v1151_v49 }
 0x19d   : > { %v1610_v52 = vpop.f32.mrb[0].mxu1 }
 0x19e   : > { %v1602_v53 = vpop.f32.mrb[0].mxu0  ;;  %v1283_v55 = vadd.f32 %v1610_v52, %v2297_v50  ;;  %v1274_v56 = vpop.f32.mrb[1].mxu1 }
 0x19f   : > { %v1251_v34 = vadd.f32 %v1602_v53, %v2297_v50  ;;  %v1242_v4 = vpop.f32.mrb[1].mxu0  ;;  %v1275_v36 = vadd.f32 %v2297_v50, %v1274_v56  ;;  %v1611_v58 = vpop.f32.mrb[2].mxu1 }
 0x1a0   : > { %1716 = vtanh.f32 %v1283_v55  ;;  %v1243_v59 = vadd.f32 %v2297_v50, %v1242_v4  ;;  %v1603_v1 = vpop.f32.mrb[2].mxu0  ;;  %v1277_v62 = vpop.f32.mrb[3].mxu1  ;;  %v1286_v3 = vadd.f32 %v1611_v58, %v2297_v50 }
 0x1a1   : > { %1718 = vtanh.f32 %v1251_v34  ;;  %v1254_v0 = vadd.f32 %v1603_v1, %v2297_v50  ;;  %v1245_v60 = vpop.f32.mrb[3].mxu0  ;;  %v1278_v7 = vadd.f32 %v2297_v50, %v1277_v62 }
 0x1a2   : > { %1720 = vtanh.f32 %v1243_v59  ;;  %v1246_v6 = vadd.f32 %v2297_v50, %v1245_v60 }
 0x1a3   : > { %1722 = vtanh.f32 %v1275_v36 }
 0x1a4   : > { %1724 = vtanh.f32 %v1254_v0 }
 0x1a5   : > { %1726 = vtanh.f32 %v1286_v3 }
 0x1a6   : > { %1728 = vtanh.f32 %v1246_v6 }
 0x1a7   : > { %1730 = vtanh.f32 %v1278_v7 }
 0x1aa   : > { %v1717_v63 = vpop.eup %1716 }
 0x1ab   : > { %v1719_v12 = vpop.eup %1718  ;;  %v1331_v13 = vmul.f32 0.5, %v1717_v63 }
 0x1ac   : > { %v1721_v39 = vpop.eup %1720  ;;  %v1323_v16 = vmul.f32 0.5, %v1719_v12 }
 0x1ad   : > { %v1723_v17 = vpop.eup %1722  ;;  %v1347_v19 = vadd.f32 0.5, %v1331_v13  ;;  %v1321_v20 = vmul.f32 0.5, %v1721_v39 }
 0x1ae   : > { %v1725_v22 = vpop.eup %1724  ;;  %v1339_v61 = vadd.f32 0.5, %v1323_v16  ;;  %v1329_v57 = vmul.f32 0.5, %v1723_v17 }
 0x1af   : > { %v1727_v18 = vpop.eup %1726  ;;  %1363 = vst.msk [vmem:[%s2311_s10 + $0x50] sm:$0xff] %vm1041_vm4, %v1347_v19  ;;  %v1337_v8 = vadd.f32 0.5, %v1321_v20  ;;  %v1324_v23 = vmul.f32 0.5, %v1725_v22 }
 0x1b0   : > { %v1729_v21 = vpop.eup %1728  ;;  %1355 = vst.msk [vmem:[%s2311_s10 + $0x10] sm:$0xff] %vm1041_vm4, %v1339_v61  ;;  %v1345_v10 = vadd.f32 0.5, %v1329_v57  ;;  %v1332_v25 = vmul.f32 0.5, %v1727_v18 }
 0x1b1   : > { %v1731_v24 = vpop.eup %1730  ;;  %1353 = vst.msk [vmem:[%s2311_s10] sm:$0xff] %vm1041_vm4, %v1337_v8  ;;  %v1340_v29 = vadd.f32 0.5, %v1324_v23  ;;  %v1322_v51 = vmul.f32 0.5, %v1729_v21 }
 0x1b2   : > { %1361 = vst.msk [vmem:[%s2311_s10 + $0x40] sm:$0xff] %vm1041_vm4, %v1345_v10  ;;  %v1348_v30 = vadd.f32 0.5, %v1332_v25  ;;  %v1330_v54 = vmul.f32 0.5, %v1731_v24 }
 0x1b3   : > { %1356 = vst.msk [vmem:[%s2311_s10 + $0x18] sm:$0xff] %vm1041_vm4, %v1340_v29  ;;  %v1338_v26 = vadd.f32 0.5, %v1322_v51 }
 0x1b4   : > { %1364 = vst.msk [vmem:[%s2311_s10 + $0x58] sm:$0xff] %vm1041_vm4, %v1348_v30  ;;  %v1346_v15 = vadd.f32 0.5, %v1330_v54 }
 0x1b5   : > { %1354 = vst.msk [vmem:[%s2311_s10 + $0x8] sm:$0xff] %vm1041_vm4, %v1338_v26 }
 0x1b6   : > { %1362 = vst.msk [vmem:[%s2311_s10 + $0x48] sm:$0xff] %vm1041_vm4, %v1346_v15 }
 0x1d9   : > { %v1614_v2 = vpop.f32.mrb[4].mxu1 }
 0x1da   : > { %v1606_v27 = vpop.f32.mrb[4].mxu0  ;;  %v1299_v33 = vadd.f32 %v1614_v2, %v2297_v50  ;;  %v1290_v37 = vpop.f32.mrb[5].mxu1 }
 0x1db   : > { %v1267_v28 = vadd.f32 %v1606_v27, %v2297_v50  ;;  %v1258_v40 = vpop.f32.mrb[5].mxu0  ;;  %v1291_v11 = vadd.f32 %v2297_v50, %v1290_v37  ;;  %v1615_v31 = vpop.f32.mrb[6].mxu1 }
 0x1dc   : > { %1732 = vtanh.f32 %v1299_v33  ;;  %v1259_v32 = vadd.f32 %v2297_v50, %v1258_v40  ;;  %v1607_v35 = vpop.f32.mrb[6].mxu0  ;;  %v1302_v5 = vadd.f32 %v1615_v31, %v2297_v50  ;;  %v1293_v38 = vpop.f32.mrb[7].mxu1 }
 0x1dd   : > { %1734 = vtanh.f32 %v1267_v28  ;;  %v1270_v41 = vadd.f32 %v1607_v35, %v2297_v50  ;;  %v1261_v43 = vpop.f32.mrb[7].mxu0  ;;  %v1294_v9 = vadd.f32 %v2297_v50, %v1293_v38 }
 0x1de   : > { %1736 = vtanh.f32 %v1259_v32  ;;  %v1262_v42 = vadd.f32 %v2297_v50, %v1261_v43 }
 0x1df   : > { %1738 = vtanh.f32 %v1291_v11 }
 0x1e0   : > { %1740 = vtanh.f32 %v1270_v41 }
 0x1e1   : > { %1742 = vtanh.f32 %v1302_v5 }
 0x1e2   : > { %1744 = vtanh.f32 %v1262_v42 }
 0x1e3   : > { %1746 = vtanh.f32 %v1294_v9 }
 0x1e6   : > { %v1733_v14 = vpop.eup %1732 }
 0x1e7   : > { %v1735_v44 = vpop.eup %1734  ;;  %v1335_v46 = vmul.f32 0.5, %v1733_v14 }
 0x1e8   : > { %v1737_v47 = vpop.eup %1736  ;;  %v1327_v48 = vmul.f32 0.5, %v1735_v44 }
 0x1e9   : > { %v1739_v45 = vpop.eup %1738  ;;  %v1351_v49 = vadd.f32 0.5, %v1335_v46  ;;  %v1325_v52 = vmul.f32 0.5, %v1737_v47 }
 0x1ea   : > { %v1741_v53 = vpop.eup %1740  ;;  %v1343_v55 = vadd.f32 0.5, %v1327_v48  ;;  %v1333_v50 = vmul.f32 0.5, %v1739_v45 }
 0x1eb   : > { %v1743_v56 = vpop.eup %1742  ;;  %1367 = vst.msk [vmem:[%s2311_s10 + $0x70] sm:$0xff] %vm1041_vm4, %v1351_v49  ;;  %v1341_v34 = vadd.f32 0.5, %v1325_v52  ;;  %v1328_v4 = vmul.f32 0.5, %v1741_v53 }
 0x1ec   : > { %v1745_v36 = vpop.eup %1744  ;;  %1359 = vst.msk [vmem:[%s2311_s10 + $0x30] sm:$0xff] %vm1041_vm4, %v1343_v55  ;;  %v1349_v58 = vadd.f32 0.5, %v1333_v50  ;;  %v1336_v59 = vmul.f32 0.5, %v1743_v56 }
 0x1ed   : > { %v1747_v1 = vpop.eup %1746  ;;  %1357 = vst.msk [vmem:[%s2311_s10 + $0x20] sm:$0xff] %vm1041_vm4, %v1341_v34  ;;  %v1344_v62 = vadd.f32 0.5, %v1328_v4  ;;  %v1326_v0 = vmul.f32 0.5, %v1745_v36 }
 0x1ee   : > { %1365 = vst.msk [vmem:[%s2311_s10 + $0x60] sm:$0xff] %vm1041_vm4, %v1349_v58  ;;  %v1352_v3 = vadd.f32 0.5, %v1336_v59  ;;  %v1334_v60 = vmul.f32 0.5, %v1747_v1 }
 0x1ef   : > { %1360 = vst.msk [vmem:[%s2311_s10 + $0x38] sm:$0xff] %vm1041_vm4, %v1344_v62  ;;  %v1342_v6 = vadd.f32 0.5, %v1326_v0 }
 0x1f0   : > { %1368 = vst.msk [vmem:[%s2311_s10 + $0x78] sm:$0xff] %vm1041_vm4, %v1352_v3  ;;  %v1350_v7 = vadd.f32 0.5, %v1334_v60 }
 0x1f1   : > { %1358 = vst.msk [vmem:[%s2311_s10 + $0x28] sm:$0xff] %vm1041_vm4, %v1342_v6 }
 0x1f2   : > { %1366 = vst.msk [vmem:[%s2311_s10 + $0x68] sm:$0xff] %vm1041_vm4, %v1350_v7 }
 0x1f3 PF: > { %s13_s12 = sadd.s32 1, %s1754_s12  }
 0x1f4   : > { %p10_p4 = scmp.ge.s32.totalorder %s13_s12, 6  }
 0x1f6   :  { %12 = sbr.rel (!%p10_p4) target bundleno = 1 (0x1), region = 64 }

</bundles_post_ra>
